<compile_context>
chip_gen: v6e
topology: v6e:2x2x1
jax: 0.10.0
libtpu: 0.0.40
codegen_flags: <defaults>
</compile_context>

<pallas_src>
import functools

import jax
import jax.numpy as jnp
from jax.experimental import pallas as pl
from jax.experimental.pallas import tpu as pltpu


def ahsv_kernel(x_ref, o_ref, *, white_thr, color_thr, gray_thr):
    # x_ref: (1, 3, TR, LW) in the caller's dtype; o_ref: (1, 3, TR, LW) f32.
    # Cast per-block on the VPU so HBM only carries the narrow input dtype.
    R = x_ref[0, 0].astype(jnp.float32)
    G = x_ref[0, 1].astype(jnp.float32)
    B = x_ref[0, 2].astype(jnp.float32)

    maxc = jnp.maximum(jnp.maximum(R, G), B)
    minc = jnp.minimum(jnp.minimum(R, G), B)
    Cc = maxc - minc

    # Channel argmax with first-occurrence tie-break (matches torch.max(dim=1)).
    is0 = (R >= G) & (R >= B)
    is1 = jnp.logical_not(is0) & (G >= B)

    # State masks; equivalent to the torch float-sentinel where() chain
    # for the intended normalized [0, 1] inputs.
    is_white = minc > white_thr
    is_colorful = jnp.logical_not(is_white) & (maxc > color_thr)
    is_achrom = is_colorful & (Cc < gray_thr)
    hue_mask = is_colorful & (Cc >= gray_thr)

    # Value used where the pixel is NOT hue-converted (single select):
    # white -> 1, achromatic -> (max+min)/2, dark -> 0.
    gray = jnp.where(is_achrom, (maxc + minc) * 0.5, is_white.astype(jnp.float32))

    # Hue in [0, 6): EUP-seeded reciprocal + one Newton step (~full f32 accuracy),
    # one fused delta/offset select instead of three full hue candidates, and a
    # range-limited conditional add instead of fmod.
    inv_C = pl.reciprocal(Cc, approx=True)
    inv_C = inv_C * (2.0 - Cc * inv_C)          # Newton refinement
    delta = jnp.where(is0, G - B, jnp.where(is1, B - R, R - G))
    offs = jnp.where(is0, 0.0, jnp.where(is1, 2.0, 4.0))
    hue = delta * inv_C + offs
    hue = jnp.where(hue < 0.0, hue + 6.0, hue)  # == ((G-B)/C) % 6 on the R-max branch
    hue = jnp.where(hue_mask, hue, 0.0)         # kill inf/NaN from Cc == 0 lanes

    # to_rgb_convert: k = (n + hue) % 6 via conditional subtract
    # (hue in [0, 6], n in {5, 3, 1} -> k_raw in [1, 12)).
    for i, n in enumerate((5.0, 3.0, 1.0)):
        k = hue + n
        k = jnp.where(k >= 6.0, k - 6.0, k)
        m = jnp.minimum(jnp.minimum(k, 4.0 - k), 1.0)
        res = 1.0 - jnp.maximum(0.0, m)
        o_ref[0, i] = jnp.where(hue_mask, res, gray).astype(o_ref.dtype)


def _choose_layout(HW):
    """Lane-dense (rows, lane_width, pad) layout for the flattened pixel axis."""
    for lw in (2048, 1024, 512, 256, 128):
        if HW % lw == 0:
            return HW // lw, lw, 0
    # Odd H*W: pad up to a lane multiple so every store is a full-width vst.
    lw = 512 if HW >= 4096 else 128
    padded = -(-HW // lw) * lw
    return padded // lw, lw, padded - HW


def _choose_tile_rows(rows, lw, n_batch, in_itemsize, out_itemsize,
                      target_bytes=4 * 1024 * 1024):
    """Row tile sized for ~target_bytes output blocks, honoring the per-dtype
    sublane multiple, and guaranteeing >= 8 grid points for non-trivial work
    (DMA double-buffering + both v7x TensorCores)."""
    sub = max(32 // in_itemsize, 32 // out_itemsize, 8)
    if rows <= sub:
        return rows                              # full dim -> always legal
    tr = max(sub, (target_bytes // (3 * lw * out_itemsize) // sub) * sub)
    tr = min(tr, rows)
    total_out_bytes = n_batch * 3 * rows * lw * out_itemsize
    if total_out_bytes > (2 * 1024 * 1024):
        need = -(-8 // n_batch)                  # row-tiles needed per batch
        cap = max(sub, (rows // max(need, 1)) // sub * sub)
        tr = min(tr, cap)
    return tr


def advanced_hsv(x, white_thr=249.0 / 255.0, color_thr=30.0 / 255.0,
                 gray_thr=5.0 / 255.0, out_dtype=jnp.float32):
    N, C, H, W = x.shape
    assert C == 3, "AdvancedHSV expects an RGB image in NCHW layout"
    HW = H * W
    in_itemsize = jnp.dtype(x.dtype).itemsize
    out_itemsize = jnp.dtype(out_dtype).itemsize

    rows, lw, pad = _choose_layout(HW)
    x_flat = x.reshape(N, 3, HW)
    if pad:
        x_flat = jnp.pad(x_flat, ((0, 0), (0, 0), (0, pad)))
    x2 = x_flat.reshape(N, 3, rows, lw)          # contiguous reshape: layout only

    tr = _choose_tile_rows(rows, lw, N, in_itemsize, out_itemsize)
    grid = (N, pl.cdiv(rows, tr))

    in_block = 3 * tr * lw * in_itemsize
    out_block = 3 * tr * lw * out_itemsize
    vmem_limit = int(min(64 * 1024 * 1024,
                         max(16 * 1024 * 1024, 3 * (in_block + out_block))))

    kern = functools.partial(
        ahsv_kernel,
        white_thr=float(white_thr),
        color_thr=float(color_thr),
        gray_thr=float(gray_thr),
    )

    out = pl.pallas_call(
        kern,
        out_shape=jax.ShapeDtypeStruct((N, 3, rows, lw), out_dtype),
        grid=grid,
        in_specs=[pl.BlockSpec((1, 3, tr, lw), lambda b, r: (b, 0, r, 0))],
        out_specs=pl.BlockSpec((1, 3, tr, lw), lambda b, r: (b, 0, r, 0)),
        compiler_params=pltpu.CompilerParams(
            dimension_semantics=("parallel", "parallel"),
            vmem_limit_bytes=vmem_limit),
    )(x2)

    out_flat = out.reshape(N, 3, rows * lw)
    if pad:
        out_flat = out_flat[:, :, :HW]
    return out_flat.reshape(N, 3, H, W)


def advanced_hsv_ref(x, white_thr, color_thr, gray_thr):
    """Pure-JAX reference reproducing the PyTorch forward exactly."""
    x = x.astype(jnp.float32)
    maxc = jnp.max(x, axis=1, keepdims=True)
    max_arg = jnp.argmax(x, axis=1, keepdims=True)
    minc = jnp.min(x, axis=1, keepdims=True)
    R, G, B = x[:, 0:1], x[:, 1:2], x[:, 2:3]
    C = maxc - minc
    gray = jnp.zeros_like(maxc)
    gray = jnp.where(minc > white_thr, 1.0, gray)
    gray = jnp.where((gray == 0.0) & (maxc > color_thr), -1.0, gray)
    gray = jnp.where((gray == -1.0) & (C < gray_thr), (maxc + minc) / 2.0, gray)
    out = jnp.full(maxc.shape, -1.0, jnp.float32)
    out = jnp.where((max_arg == 0) & (gray == -1.0), ((G - B) / C) % 6.0, out)
    out = jnp.where((max_arg == 1) & (gray == -1.0), (B - R) / C + 2.0, out)
    out = jnp.where((max_arg == 2) & (gray == -1.0), (R - G) / C + 4.0, out)
    out = jnp.where(out != -1.0, out * 60.0, out)
    out = out[:, 0]
    gray2d = gray[:, 0]
    chans = []
    for n in (5.0, 3.0, 1.0):
        k = (n + out / 60.0) % 6.0
        m = jnp.minimum(jnp.minimum(k, 4.0 - k), 1.0)
        res = 1.0 - jnp.maximum(0.0, m)
        chans.append(jnp.where(gray2d == -1.0, res, gray2d))
    return jnp.stack(chans, axis=1)


if __name__ == "__main__":
    key = jax.random.PRNGKey(0)
    white_thr, color_thr, gray_thr = 249.0 / 255.0, 30.0 / 255.0, 5.0 / 255.0

    # Case 1: lane-aligned spatial size (H*W multiple of 128), f32 input.
    N, C, H, W = 2, 3, 16, 16
    x = jax.random.uniform(key, (N, C, H, W), dtype=jnp.float32)
    x = x.at[0, :, 0, 0].set(1.0)     # white pixel (min > white_thr)
    x = x.at[0, :, 0, 1].set(0.5)     # achromatic pixel (C < gray_thr)
    x = x.at[0, :, 0, 2].set(0.01)    # dark pixel (max <= color_thr)

    out = jax.block_until_ready(advanced_hsv(x, white_thr, color_thr, gray_thr))
    ref = advanced_hsv_ref(x, white_thr, color_thr, gray_thr)
    assert out.shape == (N, 3, H, W)
    assert jnp.allclose(out, ref, atol=2e-5, rtol=1e-5), "mismatch (aligned f32)"

    # Case 2: odd H*W -> exercises the pad-to-lane-multiple fallback path.
    x_odd = jax.random.uniform(jax.random.PRNGKey(1), (1, 3, 10, 12),
                               dtype=jnp.float32)
    out2 = jax.block_until_ready(advanced_hsv(x_odd, white_thr, color_thr, gray_thr))
    ref2 = advanced_hsv_ref(x_odd, white_thr, color_thr, gray_thr)
    assert jnp.allclose(out2, ref2, atol=2e-5, rtol=1e-5), "mismatch (padded path)"

    # Case 3: native bf16 input, cast to f32 inside the kernel.
    xb = x.astype(jnp.bfloat16)
    out3 = jax.block_until_ready(advanced_hsv(xb, white_thr, color_thr, gray_thr))
    ref3 = advanced_hsv_ref(xb.astype(jnp.float32), white_thr, color_thr, gray_thr)
    assert jnp.allclose(out3, ref3, atol=2e-5, rtol=1e-5), "mismatch (bf16 input)"

    print("KERNEL_OK")
</pallas_src>

<mosaic_0001>
module attributes {stable_mosaic.version = 11 : i64} {
  func.func @ahsv_kernel(%arg0: i32, %arg1: i32, %arg2: memref<1x3x1x256xf32, #tpu.memory_space<vmem>>, %arg3: memref<1x3x1x256xf32, #tpu.memory_space<vmem>>) attributes {dimension_semantics = [#tpu.dimension_semantics<parallel>, #tpu.dimension_semantics<parallel>], iteration_bounds = array<i64: 2, 1>, scalar_prefetch = 0 : i64, scratch_operands = 0 : i64, tpu.core_type = #tpu.core_type<tc>, window_params = [{transform_indices = @transform_0, window_bounds = array<i64: 1, 3, 1, 256>}, {transform_indices = @transform_1, window_bounds = array<i64: 1, 3, 1, 256>}]} {
    %c0 = arith.constant 0 : index
    %c0_0 = arith.constant 0 : index
    %c0_1 = arith.constant 0 : index
    %c0_2 = arith.constant 0 : index
    %0 = vector.load %arg2[%c0, %c0_0, %c0_1, %c0_2] : memref<1x3x1x256xf32, #tpu.memory_space<vmem>>, vector<1x1x1x256xf32>
    %1 = vector.shape_cast %0 : vector<1x1x1x256xf32> to vector<1x256xf32>
    %c0_3 = arith.constant 0 : index
    %c1 = arith.constant 1 : index
    %c0_4 = arith.constant 0 : index
    %c0_5 = arith.constant 0 : index
    %2 = vector.load %arg2[%c0_3, %c1, %c0_4, %c0_5] : memref<1x3x1x256xf32, #tpu.memory_space<vmem>>, vector<1x1x1x256xf32>
    %3 = vector.shape_cast %2 : vector<1x1x1x256xf32> to vector<1x256xf32>
    %c0_6 = arith.constant 0 : index
    %c2 = arith.constant 2 : index
    %c0_7 = arith.constant 0 : index
    %c0_8 = arith.constant 0 : index
    %4 = vector.load %arg2[%c0_6, %c2, %c0_7, %c0_8] : memref<1x3x1x256xf32, #tpu.memory_space<vmem>>, vector<1x1x1x256xf32>
    %5 = vector.shape_cast %4 : vector<1x1x1x256xf32> to vector<1x256xf32>
    %6 = arith.maximumf %1, %3 : vector<1x256xf32>
    %7 = arith.maximumf %6, %5 : vector<1x256xf32>
    %8 = arith.minimumf %1, %3 : vector<1x256xf32>
    %9 = arith.minimumf %8, %5 : vector<1x256xf32>
    %10 = arith.subf %7, %9 : vector<1x256xf32>
    %11 = arith.cmpf oge, %1, %3 : vector<1x256xf32>
    %12 = arith.cmpf oge, %1, %5 : vector<1x256xf32>
    %13 = arith.andi %11, %12 : vector<1x256xi1>
    %cst = arith.constant dense<true> : vector<1x256xi1>
    %14 = arith.xori %13, %cst : vector<1x256xi1>
    %15 = arith.cmpf oge, %3, %5 : vector<1x256xf32>
    %16 = arith.andi %14, %15 : vector<1x256xi1>
    %cst_9 = arith.constant 0.976470589 : f32
    %17 = vector.broadcast %cst_9 : f32 to vector<1x256xf32>
    %18 = arith.cmpf ogt, %9, %17 : vector<1x256xf32>
    %cst_10 = arith.constant dense<true> : vector<1x256xi1>
    %19 = arith.xori %18, %cst_10 : vector<1x256xi1>
    %cst_11 = arith.constant 0.117647059 : f32
    %20 = vector.broadcast %cst_11 : f32 to vector<1x256xf32>
    %21 = arith.cmpf ogt, %7, %20 : vector<1x256xf32>
    %22 = arith.andi %19, %21 : vector<1x256xi1>
    %cst_12 = arith.constant 0.0196078438 : f32
    %23 = vector.broadcast %cst_12 : f32 to vector<1x256xf32>
    %24 = arith.cmpf olt, %10, %23 : vector<1x256xf32>
    %25 = arith.andi %22, %24 : vector<1x256xi1>
    %cst_13 = arith.constant 0.0196078438 : f32
    %26 = vector.broadcast %cst_13 : f32 to vector<1x256xf32>
    %27 = arith.cmpf oge, %10, %26 : vector<1x256xf32>
    %28 = arith.andi %22, %27 : vector<1x256xi1>
    %29 = arith.addf %7, %9 : vector<1x256xf32>
    %cst_14 = arith.constant 5.000000e-01 : f32
    %30 = vector.broadcast %cst_14 : f32 to vector<1x256xf32>
    %31 = arith.mulf %29, %30 : vector<1x256xf32>
    %32 = arith.extui %18 : vector<1x256xi1> to vector<1x256xi32>
    %33 = arith.sitofp %32 : vector<1x256xi32> to vector<1x256xf32>
    %34 = arith.select %25, %31, %33 : vector<1x256xi1>, vector<1x256xf32>
    %35 = tpu.reciprocal %10 {approx = true} : vector<1x256xf32> -> vector<1x256xf32>
    %36 = arith.mulf %10, %35 : vector<1x256xf32>
    %cst_15 = arith.constant 2.000000e+00 : f32
    %37 = vector.broadcast %cst_15 : f32 to vector<1x256xf32>
    %38 = arith.subf %37, %36 : vector<1x256xf32>
    %39 = arith.mulf %35, %38 : vector<1x256xf32>
    %40 = arith.subf %3, %5 : vector<1x256xf32>
    %41 = arith.subf %5, %1 : vector<1x256xf32>
    %42 = arith.subf %1, %3 : vector<1x256xf32>
    %43 = arith.select %16, %41, %42 : vector<1x256xi1>, vector<1x256xf32>
    %44 = arith.select %13, %40, %43 : vector<1x256xi1>, vector<1x256xf32>
    %cst_16 = arith.constant 2.000000e+00 : f32
    %cst_17 = arith.constant 4.000000e+00 : f32
    %45 = vector.broadcast %cst_16 : f32 to vector<1x256xf32>
    %46 = vector.broadcast %cst_17 : f32 to vector<1x256xf32>
    %47 = arith.select %16, %45, %46 : vector<1x256xi1>, vector<1x256xf32>
    %cst_18 = arith.constant 0.000000e+00 : f32
    %48 = vector.broadcast %cst_18 : f32 to vector<1x256xf32>
    %49 = arith.select %13, %48, %47 : vector<1x256xi1>, vector<1x256xf32>
    %50 = arith.mulf %44, %39 : vector<1x256xf32>
    %51 = arith.addf %50, %49 : vector<1x256xf32>
    %cst_19 = arith.constant 0.000000e+00 : f32
    %52 = vector.broadcast %cst_19 : f32 to vector<1x256xf32>
    %53 = arith.cmpf olt, %51, %52 : vector<1x256xf32>
    %cst_20 = arith.constant 6.000000e+00 : f32
    %54 = vector.broadcast %cst_20 : f32 to vector<1x256xf32>
    %55 = arith.addf %51, %54 : vector<1x256xf32>
    %56 = arith.select %53, %55, %51 : vector<1x256xi1>, vector<1x256xf32>
    %cst_21 = arith.constant 0.000000e+00 : f32
    %57 = vector.broadcast %cst_21 : f32 to vector<1x256xf32>
    %58 = arith.select %28, %56, %57 : vector<1x256xi1>, vector<1x256xf32>
    %cst_22 = arith.constant 5.000000e+00 : f32
    %59 = vector.broadcast %cst_22 : f32 to vector<1x256xf32>
    %60 = arith.addf %58, %59 : vector<1x256xf32>
    %cst_23 = arith.constant 6.000000e+00 : f32
    %61 = vector.broadcast %cst_23 : f32 to vector<1x256xf32>
    %62 = arith.cmpf oge, %60, %61 : vector<1x256xf32>
    %cst_24 = arith.constant 6.000000e+00 : f32
    %63 = vector.broadcast %cst_24 : f32 to vector<1x256xf32>
    %64 = arith.subf %60, %63 : vector<1x256xf32>
    %65 = arith.select %62, %64, %60 : vector<1x256xi1>, vector<1x256xf32>
    %cst_25 = arith.constant 4.000000e+00 : f32
    %66 = vector.broadcast %cst_25 : f32 to vector<1x256xf32>
    %67 = arith.subf %66, %65 : vector<1x256xf32>
    %68 = arith.minimumf %65, %67 : vector<1x256xf32>
    %cst_26 = arith.constant 1.000000e+00 : f32
    %69 = vector.broadcast %cst_26 : f32 to vector<1x256xf32>
    %70 = arith.minimumf %68, %69 : vector<1x256xf32>
    %cst_27 = arith.constant 0.000000e+00 : f32
    %71 = vector.broadcast %cst_27 : f32 to vector<1x256xf32>
    %72 = arith.maximumf %71, %70 : vector<1x256xf32>
    %cst_28 = arith.constant 1.000000e+00 : f32
    %73 = vector.broadcast %cst_28 : f32 to vector<1x256xf32>
    %74 = arith.subf %73, %72 : vector<1x256xf32>
    %75 = arith.select %28, %74, %34 : vector<1x256xi1>, vector<1x256xf32>
    %c0_29 = arith.constant 0 : index
    %c0_30 = arith.constant 0 : index
    %c0_31 = arith.constant 0 : index
    %c0_32 = arith.constant 0 : index
    %76 = vector.load %arg3[%c0_29, %c0_30, %c0_31, %c0_32] : memref<1x3x1x256xf32, #tpu.memory_space<vmem>>, vector<1x1x1x256xf32>
    %77 = vector.shape_cast %76 : vector<1x1x1x256xf32> to vector<1x256xf32>
    %78 = vector.shape_cast %75 : vector<1x256xf32> to vector<1x1x1x256xf32>
    tpu.vector_store %arg3[%c0_29, %c0_30, %c0_31, %c0_32], %78 {strides = array<i32>} : memref<1x3x1x256xf32, #tpu.memory_space<vmem>>, vector<1x1x1x256xf32>,
    %cst_33 = arith.constant 3.000000e+00 : f32
    %79 = vector.broadcast %cst_33 : f32 to vector<1x256xf32>
    %80 = arith.addf %58, %79 : vector<1x256xf32>
    %cst_34 = arith.constant 6.000000e+00 : f32
    %81 = vector.broadcast %cst_34 : f32 to vector<1x256xf32>
    %82 = arith.cmpf oge, %80, %81 : vector<1x256xf32>
    %cst_35 = arith.constant 6.000000e+00 : f32
    %83 = vector.broadcast %cst_35 : f32 to vector<1x256xf32>
    %84 = arith.subf %80, %83 : vector<1x256xf32>
    %85 = arith.select %82, %84, %80 : vector<1x256xi1>, vector<1x256xf32>
    %cst_36 = arith.constant 4.000000e+00 : f32
    %86 = vector.broadcast %cst_36 : f32 to vector<1x256xf32>
    %87 = arith.subf %86, %85 : vector<1x256xf32>
    %88 = arith.minimumf %85, %87 : vector<1x256xf32>
    %cst_37 = arith.constant 1.000000e+00 : f32
    %89 = vector.broadcast %cst_37 : f32 to vector<1x256xf32>
    %90 = arith.minimumf %88, %89 : vector<1x256xf32>
    %cst_38 = arith.constant 0.000000e+00 : f32
    %91 = vector.broadcast %cst_38 : f32 to vector<1x256xf32>
    %92 = arith.maximumf %91, %90 : vector<1x256xf32>
    %cst_39 = arith.constant 1.000000e+00 : f32
    %93 = vector.broadcast %cst_39 : f32 to vector<1x256xf32>
    %94 = arith.subf %93, %92 : vector<1x256xf32>
    %95 = arith.select %28, %94, %34 : vector<1x256xi1>, vector<1x256xf32>
    %c0_40 = arith.constant 0 : index
    %c1_41 = arith.constant 1 : index
    %c0_42 = arith.constant 0 : index
    %c0_43 = arith.constant 0 : index
    %96 = vector.load %arg3[%c0_40, %c1_41, %c0_42, %c0_43] : memref<1x3x1x256xf32, #tpu.memory_space<vmem>>, vector<1x1x1x256xf32>
    %97 = vector.shape_cast %96 : vector<1x1x1x256xf32> to vector<1x256xf32>
    %98 = vector.shape_cast %95 : vector<1x256xf32> to vector<1x1x1x256xf32>
    tpu.vector_store %arg3[%c0_40, %c1_41, %c0_42, %c0_43], %98 {strides = array<i32>} : memref<1x3x1x256xf32, #tpu.memory_space<vmem>>, vector<1x1x1x256xf32>,
    %cst_44 = arith.constant 1.000000e+00 : f32
    %99 = vector.broadcast %cst_44 : f32 to vector<1x256xf32>
    %100 = arith.addf %58, %99 : vector<1x256xf32>
    %cst_45 = arith.constant 6.000000e+00 : f32
    %101 = vector.broadcast %cst_45 : f32 to vector<1x256xf32>
    %102 = arith.cmpf oge, %100, %101 : vector<1x256xf32>
    %cst_46 = arith.constant 6.000000e+00 : f32
    %103 = vector.broadcast %cst_46 : f32 to vector<1x256xf32>
    %104 = arith.subf %100, %103 : vector<1x256xf32>
    %105 = arith.select %102, %104, %100 : vector<1x256xi1>, vector<1x256xf32>
    %cst_47 = arith.constant 4.000000e+00 : f32
    %106 = vector.broadcast %cst_47 : f32 to vector<1x256xf32>
    %107 = arith.subf %106, %105 : vector<1x256xf32>
    %108 = arith.minimumf %105, %107 : vector<1x256xf32>
    %cst_48 = arith.constant 1.000000e+00 : f32
    %109 = vector.broadcast %cst_48 : f32 to vector<1x256xf32>
    %110 = arith.minimumf %108, %109 : vector<1x256xf32>
    %cst_49 = arith.constant 0.000000e+00 : f32
    %111 = vector.broadcast %cst_49 : f32 to vector<1x256xf32>
    %112 = arith.maximumf %111, %110 : vector<1x256xf32>
    %cst_50 = arith.constant 1.000000e+00 : f32
    %113 = vector.broadcast %cst_50 : f32 to vector<1x256xf32>
    %114 = arith.subf %113, %112 : vector<1x256xf32>
    %115 = arith.select %28, %114, %34 : vector<1x256xi1>, vector<1x256xf32>
    %c0_51 = arith.constant 0 : index
    %c2_52 = arith.constant 2 : index
    %c0_53 = arith.constant 0 : index
    %c0_54 = arith.constant 0 : index
    %116 = vector.load %arg3[%c0_51, %c2_52, %c0_53, %c0_54] : memref<1x3x1x256xf32, #tpu.memory_space<vmem>>, vector<1x1x1x256xf32>
    %117 = vector.shape_cast %116 : vector<1x1x1x256xf32> to vector<1x256xf32>
    %118 = vector.shape_cast %115 : vector<1x256xf32> to vector<1x1x1x256xf32>
    tpu.vector_store %arg3[%c0_51, %c2_52, %c0_53, %c0_54], %118 {strides = array<i32>} : memref<1x3x1x256xf32, #tpu.memory_space<vmem>>, vector<1x1x1x256xf32>,
    return
  }
  func.func @transform_0(%arg0: i32, %arg1: i32) -> (i32, i32, i32, i32) {
    %c0_i32 = arith.constant 0 : i32
    %c0_i32_0 = arith.constant 0 : i32
    %c0_i32_1 = arith.constant 0 : i32
    return %arg0, %c0_i32, %arg1, %c0_i32_0 : i32, i32, i32, i32
  }
  func.func @transform_1(%arg0: i32, %arg1: i32) -> (i32, i32, i32, i32) {
    %c0_i32 = arith.constant 0 : i32
    %c0_i32_0 = arith.constant 0 : i32
    %c0_i32_1 = arith.constant 0 : i32
    return %arg0, %c0_i32, %arg1, %c0_i32_0 : i32, i32, i32, i32
  }
}

</mosaic_0001>

<bundles_post_ra>
// kernel: tpu_custom_call.1
= control target key start
LH: loop header
LB: loop body
LE: loop exit
PB: predicated region body
PF: predicated region fallthrough
CT: control target
= control target key end

     0   :  { %6 = vsyncpa [#allocation3], 0  ;;  %s746_s0 = inlined_call_operand.hbm [shape: f32[2,3,1,256], index: 0, kind: input, shape index: {}]   ;;  %s747_s1 = inlined_call_operand.hbm [shape: f32[2,3,1,256], index: 1, kind: output, shape index: {}]  }
   0x1   :  { %8 = vsyncpa [#allocation3 + $0x1], 0 }
   0x2   :  { %9 = vsyncpa [#allocation4], 0 }
   0x3   :  { %11 = vsyncpa [#allocation4 + $0x1], 0  ;;  %s562_s6 = smov 0   ;;  %s564_s7 = smov 0  }
   0x4   :  { %s566_s8 = smov 0   ;;  %s568_s9 = smov 0  }
   0x5   :  { %s570_s10 = smov 0   ;;  %s572_s11 = smov 0  }
   0x6 LB: > { %s341_s12 = sadd.s32 4294967295, %s541_s11   ;;  %s342_s13 = sadd.s32 4294967294, %s541_s11   ;;  %s541_s11 = sphi %s572_s11, %s17_s11   ;;  %s537_s10 = sphi %s570_s10, %s764_s10   ;;  %s533_s9 = sphi %s568_s9, %s763_s9   ;;  %s529_s8 = sphi %s566_s8, %s762_s8   ;;  %s525_s7 = sphi %s564_s7, %s761_s7   ;;  %s521_s6 = sphi %s562_s6, %s760_s6  }
   0x7   : > { %s29_s14 = sadd.s32 1, %s537_s10  ;;  %s38_s15 = sadd.s32 1, %s529_s8 }
   0x8   : > { %p31_p0 = scmp.ge.s32.totalorder %s29_s14, 2  ;;  %p45_p1 = scmp.ne.s32.totalorder %s529_s8, %s525_s7 }
   0x9   : > { %p46_p2 = scmp.eq.s32.totalorder %s541_s11, 0  ;;  %p51_p3 = scmp.ne.s32.totalorder %s525_s7, %s521_s6 }
   0xa   : > { %s766_s14 = smov (%p31_p0, %s29_s14), 0  ;;  %p52_p5 = scmp.eq.s32.totalorder %s341_s12, 0 }
   0xb   : > { %p603_p4 = por %p46_p2, %p45_p1  ;;  %s33_s17 = ssub.s32 %s537_s10, %s766_s14 }
   0xc   : > { %p77_p6 = scmp.eq.s32.totalorder %s341_s12, 1  ;;  %p36_p7 = scmp.eq.s32.totalorder %s33_s17, 0 }
   0xd   : > { %p609_p8 = por %p52_p5, %p51_p3  ;;  %p83_p10 = scmp.eq.s32.totalorder %s342_s13, 1 }
   0xe   : > { %p613_p9 = por %p77_p6, %p45_p1  ;;  %p374_p13 = scmp.lt.s32.totalorder %s541_s11, 2 }
   0xf   : > { %s618_s20 = scalar_select %p36_p7, %s529_s8, %s38_s15  }
  0x10   : > { %p620_p11 = por %p83_p10, %p51_p3  ;;  %s103_s22 = sand.u32 1, %s529_s8  }
  0x11   : > { %s358_s23 = smul.u32 6, %s103_s22  ;;  %p630_p0 = pnand %p374_p13, %p603_p4 }
  0x12   : > { %s359_s24 = smul.u32 96, %s537_s10  ;;  %p346_p1 = scmp.ge.s32.totalorder %s541_s11, 1 }
  0x13   : > { %s107_s29 = scalar_lea.vmem [#allocation2], %s358_s23  ;;  %s104_s2 = scalar_lea.sflag [#allocation3], %s103_s22 }
  0x14   : > { %s115_s28 = scalar_lea.hbm %s746_s0, %s359_s24  ;;  %s116_s30 = sshll.u32 %s107_s29, 4  ;;  %s117_s30 = int_to_ptr.vmem [resolvable:$true] %s116_s30 }
  0x15   : > { %p435_p2 = pneg %p630_p0  ;;  %s446_s3 = scalar_lea.vmem %s117_s30, 96 }
  0x16   : > { %p447_p3 = scmp.ne.s32.totalorder %s117_s30, %s446_s3  ;;  %s543_s4 = smov [#allocation2]  }
  0x17   : > { %s451_s5 = sshll.u32 %s543_s4, 4  ;;  %s452_s5 = int_to_ptr.vmem [resolvable:$false] %s451_s5 }
  0x18   : > { %p449_p5 = pnand %p447_p3, %p435_p2  ;;  %s453_s12 = scalar_lea.vmem %s452_s5, 192 }
  0x19   : > { %p454_p4 = scmp.lt.s32.totalorder %s117_s30, %s452_s5  ;;  %p455_p7 = scmp.lt.s32.totalorder %s453_s12, %s446_s3 }
  0x1a   : > { %p450_p6 = pneg %p449_p5 }
  0x1b   : > { %p456_p10 = por %p455_p7, %p454_p4 }
  0x1d   : > { %p457_p13 = pnand %p456_p10, %p450_p6 }
  0x1f   : > { %460 = shalt.err (!%p457_p13)
}
  0x20   : > { %s544_s13 = smov 32   ;;  %s545_s15 = smov 2  }
  0x21   : > { %369 = dma.hbm_to_vmem [thread:$0]  (!%p630_p0), %s115_s28, 96, %s117_s30, %s104_s2, %s544_s13, %s544_s13, %s545_s15  }
  0x22   : > { %p124_p12 = scmp.lt.s32.totalorder %s541_s11, 3 }
  0x24   : > { %p125_p2 = pnand %p346_p1, %p124_p12 }
  0x25   : > { %s646_s16 = sand.u32 (!%p125_p2), 1, %s525_s7  }
  0x26   : > { %128 = sbr.rel (%p125_p2) target bundleno = 110 (0x6e), region = 24  ;;  %s131_s22 = scalar_lea.sflag (!%p125_p2), [#allocation3], %s646_s16 }
  0x27   : > { %s360_s17 = smul.u32 (!%p125_p2), 6, %s646_s16 }
  0x29   : > { %s134_s23 = scalar_lea.vmem (!%p125_p2), [#allocation2], %s360_s17 }
  0x2b   : > { %512 = dma.done.wait (%p609_p8), %s131_s22, 96  }
  0x2c   : > { %514 = vsyncadd (%p609_p8), %s131_s22, 4294967200  ;;  %v153_v0 = vld [vmem:[%s134_s23] sm:$0x3]  ;;  %v347_v1 = vld [vmem:[%s134_s23 + $0x2] sm:$0x3]  ;;  %vm546_vm3 = vmmov 1   ;;  %v209_v48 = vlaneseq }
  0x2d   : > { %v348_v2 = vld [vmem:[%s134_s23 + $0x4] sm:$0x3]  ;;  %v158_v3 = vmax.f32 %v153_v0, %v347_v1  ;;  %v160_v4 = vmin.f32 %v153_v0, %v347_v1  ;;  %vm163_vm0 = vcmp.ge.f32.partialorder %v153_v0, %v347_v1  ;;  %v188_v10 = vsub.f32 %v153_v0, %v347_v1  ;;  %s152_s18 = scalar_lea.vmem [#allocation5], %s360_s17  ;;  %s361_s25 = smul.u32 96, %s533_s9 }
  0x2e   : > { %vm164_vm1 = vcmp.ge.f32.partialorder %v153_v0, %v348_v2  ;;  %vm167_vm5 = vcmp.ge.f32.partialorder %v347_v1, %v348_v2  ;;  %v187_v9 = vsub.f32 %v348_v2, %v153_v0  ;;  %v186_v12 = vsub.f32 %v347_v1, %v348_v2  ;;  %s254_s24 = sshll.u32 %s152_s18, 4  ;;  %s239_s28 = scalar_lea.sflag [#allocation4], %s646_s16  ;;  %s687_s24 = int_to_ptr.vmem [resolvable:$true] %s254_s24 }
  0x2f   : > { %v159_v5 = vmax.f32 %v158_v3, %v348_v2  ;;  %v161_v6 = vmin.f32 %v160_v4, %v348_v2  ;;  %vm656_vm2 = vmand %vm163_vm0, %vm164_vm1  ;;  %v547_v16 = vmov 4.0   ;;  %v548_v45 = vmov 0.0   ;;  %s696_s27 = scalar_lea.hbm %s747_s1, %s361_s25  ;;  %s461_s29 = scalar_lea.vmem %s687_s24, 96 }
  0x30   : > { %vm166_vm4 = vmxor %vm656_vm2, %vm546_vm3  ;;  %p462_p8 = scmp.ne.s32.totalorder %s687_s24, %s461_s29  ;;  %s549_s30 = smov [#allocation5]  }
  0x31   : > { %v162_v7 = vsub.f32 %v159_v5, %v161_v6  ;;  %vm168_vm6 = vmand %vm166_vm4, %vm167_vm5  ;;  %vm169_vm7 = vcmp.gt.f32.partialorder %v161_v6, 0.9764706  ;;  %vm171_vm9 = vcmp.gt.f32.partialorder %v159_v5, 0.11764706  ;;  %v177_v34 = vadd.f32 %v161_v6, %v159_v5  ;;  %s465_s2 = sshll.u32 %s549_s30, 4  ;;  %s466_s2 = int_to_ptr.vmem [resolvable:$false] %s465_s2 }
  0x32   : > { %v189_v14 = vsel %vm168_vm6, %v187_v9, %v188_v10  ;;  %v191_v17 = vsel %vm168_vm6, 2.0, %v547_v16  ;;  %vm170_vm8 = vmxor %vm169_vm7, %vm546_vm3  ;;  %v349_v46 = vsel %vm169_vm7, 1.0, %v548_v45  ;;  %vm211_vm3 = vcmp.lt.s32.totalorder %v209_v48, 256  ;;  %p463_p12 = pnand %p462_p8, %p613_p9  ;;  %s467_s3 = scalar_lea.vmem %s466_s2, 192 }
  0x33   : > { %431 = vrcp.f32 %v162_v7  ;;  %v190_v18 = vsel %vm656_vm2, %v186_v12, %v189_v14  ;;  %v192_v20 = vsel %vm656_vm2, 0.0, %v191_v17  ;;  %vm669_vm10 = vmand %vm170_vm8, %vm171_vm9  ;;  %vm175_vm11 = vcmp.ge.f32.partialorder %v162_v7, 0.019607844  ;;  %p468_p1 = scmp.lt.s32.totalorder %s687_s24, %s466_s2  ;;  %p469_p3 = scmp.lt.s32.totalorder %s467_s3, %s461_s29 }
  0x34   : > { %vm675_vm12 = vmand %vm669_vm10, %vm175_vm11  ;;  %vm173_vm1 = vcmp.lt.f32.partialorder %v162_v7, 0.019607844  ;;  %v178_v43 = vmul.f32 0.5, %v177_v34  ;;  %p464_p0 = pneg %p463_p12 }
  0x35   : > { %vm174_vm2 = vmand %vm669_vm10, %vm173_vm1  ;;  %p470_p5 = por %p469_p3, %p468_p1 }
  0x36   : > { %v181_v53 = vsel %vm174_vm2, %v178_v43, %v349_v46 }
  0x37   : > { %p471_p6 = pnand %p470_p5, %p464_p0 }
  0x40   : > { %v432_v11 = vpop.eup %431 }
  0x41   : > { %v183_v13 = vmul.f32 %v432_v11, %v162_v7 }
  0x43   : > { %v184_v15 = vsub.f32 2.0, %v183_v13 }
  0x45   : > { %v185_v19 = vmul.f32 %v432_v11, %v184_v15 }
  0x47   : > { %v193_v21 = vmul.f32 %v190_v18, %v185_v19 }
  0x49   : > { %v194_v23 = vadd.f32 %v193_v21, %v192_v20 }
  0x4b   : > { %vm195_vm13 = vcmp.lt.f32.partialorder %v194_v23, 0.0  ;;  %v196_v25 = vadd.f32 6.0, %v194_v23 }
  0x4d   : > { %v197_v26 = vsel %vm195_vm13, %v196_v25, %v194_v23 }
  0x4e   : > { %v198_v27 = vsel %vm675_vm12, %v197_v26, 0.0 }
  0x4f   : > { %v199_v28 = vadd.f32 5.0, %v198_v27  ;;  %v214_v29 = vadd.f32 3.0, %v198_v27  ;;  %v226_v30 = vadd.f32 1.0, %v198_v27 }
  0x51   : > { %vm200_vm14 = vcmp.ge.f32.partialorder %v199_v28, 6.0  ;;  %v350_v31 = vadd.f32 -6.0, %v199_v28  ;;  %vm215_vm15 = vcmp.ge.f32.partialorder %v214_v29, 6.0  ;;  %v351_v32 = vadd.f32 -6.0, %v214_v29 }
  0x52   : > { %vm227_vm0 = vcmp.ge.f32.partialorder %v226_v30, 6.0  ;;  %v353_v33 = vadd.f32 -6.0, %v226_v30 }
  0x53   : > { %v202_v35 = vsel %vm200_vm14, %v350_v31, %v199_v28  ;;  %v217_v36 = vsel %vm215_vm15, %v351_v32, %v214_v29 }
  0x54   : > { %v203_v37 = vsub.f32 4.0, %v202_v35  ;;  %v218_v38 = vsub.f32 4.0, %v217_v36  ;;  %v229_v39 = vsel %vm227_vm0, %v353_v33, %v226_v30 }
  0x55   : > { %v230_v40 = vsub.f32 4.0, %v229_v39 }
  0x56   : > { %v204_v41 = vmin.f32 %v202_v35, %v203_v37  ;;  %v219_v42 = vmin.f32 %v217_v36, %v218_v38 }
  0x57   : > { %v231_v44 = vmin.f32 %v229_v39, %v230_v40 }
  0x58   : > { %v205_v47 = vmin.f32 %v204_v41, 1.0  ;;  %v220_v49 = vmin.f32 %v219_v42, 1.0 }
  0x59   : > { %v232_v50 = vmin.f32 %v231_v44, 1.0 }
  0x5a   : > { %v206_v51 = vmax.f32 %v205_v47, 0.0  ;;  %v221_v52 = vmax.f32 %v220_v49, 0.0 }
  0x5b   : > { %v233_v54 = vmax.f32 %v232_v50, 0.0 }
  0x5c   : > { %v207_v55 = vsub.f32 1.0, %v206_v51  ;;  %v222_v56 = vsub.f32 1.0, %v221_v52 }
  0x5d   : > { %v234_v57 = vsub.f32 1.0, %v233_v54 }
  0x5e   : > { %v208_v58 = vsel %vm675_vm12, %v207_v55, %v181_v53  ;;  %v223_v59 = vsel %vm675_vm12, %v222_v56, %v181_v53 }
  0x5f   : > { %213 = vst.msk [vmem:[%s152_s18] sm:$0x3] %vm211_vm3, %v208_v58  ;;  %352 = vst.msk [vmem:[%s152_s18 + $0x2] sm:$0x3] %vm211_vm3, %v223_v59  ;;  %v235_v60 = vsel %vm675_vm12, %v234_v57, %v181_v53 }
  0x60   : > { %354 = vst.msk [vmem:[%s152_s18 + $0x4] sm:$0x3] %vm211_vm3, %v235_v60 }
  0x61   : > { %474 = shalt.err (!%p471_p6)
}
  0x62   : > { %s475_s4 = scalar_lea.hbm %s696_s27, 96  ;;  %s479_s13 = scalar_lea.hbm %s747_s1, 192 }
  0x63   : > { %p476_p4 = scmp.ne.s32.totalorder %s696_s27, %s475_s4  ;;  %p480_p13 = scmp.lt.s32.totalorder %s696_s27, %s747_s1 }
  0x64   : > { %p481_p2 = scmp.lt.s32.totalorder %s479_s13, %s475_s4 }
  0x65   : > { %p477_p7 = pnand %p476_p4, %p613_p9 }
  0x66   : > { %p482_p8 = por %p481_p2, %p480_p13 }
  0x67   : > { %p478_p10 = pneg %p477_p7 }
  0x69   : > { %p483_p12 = pnand %p482_p8, %p478_p10 }
  0x6b   : > { %486 = shalt.err (!%p483_p12)
}
  0x6c   : > { %s550_s22 = smov 32   ;;  %s551_s23 = smov 2  }
  0x6d   : > { %364 = dma.vmem_to_hbm [thread:$0]  (%p613_p9), %s687_s24, 96, %s696_s27, %s239_s28, %s550_s22, %s550_s22, %s551_s23  }
  0x6e PF: > { %s269_s18 = sand.u32 1, %s521_s6   ;;  %p759_p0 = scmp.ge.s32.totalorder %s541_s11, 2 }
  0x6f   : > { %s270_s25 = scalar_lea.sflag [#allocation4], %s269_s18 }
  0x70   : > { %p371_p1 = pnand %p759_p0, %p620_p11 }
  0x72   : > { %p372_p3 = pneg %p371_p1 }
  0x74   : > { %516 = dma.done.wait (%p372_p3), %s270_s25, 96  }
  0x75   : > { %518 = vsyncadd (%p372_p3), %s270_s25, 4294967200  ;;  %s17_s11 = sadd.s32 1, %s541_s11   ;;  %s760_s6 = smov %s525_s7 }
  0x76   : > { %p14_p5 = scmp.ge.s32.totalorder %s17_s11, 4   ;;  %s761_s7 = smov %s529_s8 }
  0x77   : > { %s762_s8 = smov %s618_s20  ;;  %s763_s9 = smov %s537_s10 }
  0x78   : > { %s764_s10 = smov %s766_s14  ;;  %16 = sbr.rel (!%p14_p5) target bundleno = 6 (0x6), region = 73 }
  0x7d   :  { %275 = vsyncpa [#allocation3], 1 }
  0x7e   :  { %277 = vsyncpa [#allocation3 + $0x1], 1 }
  0x7f   :  { %278 = vsyncpa [#allocation4], 1 }
  0x80   :  { %280 = vsyncpa [#allocation4 + $0x1], 1 }

</bundles_post_ra>
